<compile_context>
chip_gen: v7x
topology: tpu7x:2x2x1
jax: 0.10.0
libtpu: 0.0.40
codegen_flags: <defaults>
</compile_context>

<pallas_src>
import math

import numpy as np
import jax
import jax.numpy as jnp
from jax.experimental import pallas as pl
from jax.experimental.pallas import tpu as pltpu


# ---------------------------------------------------------------------------
# Fused Pallas kernel (built per static shape configuration)
# ---------------------------------------------------------------------------
def _make_ghost_kernel(cin, init_c, new_c, oup, img_w, hw, share_x1, use_mxu):
    """All sizes are static Python ints; the kernel is fully unrolled."""
    # 3x3 taps, dh outer / dw inner; offset on the flattened H*W (lane) axis.
    offsets = [dh * img_w + dw for dh in (-1, 0, 1) for dw in (-1, 0, 1)]

    def kernel(x_ref, wp_ref, bp_ref, wd_ref, bd_ref, mask_ref, o_ref):
        # x_ref:    (1, cin, hw)   one image; channels on sublanes, pixels on lanes
        # wp_ref:   (ctot, cin)    BN-folded primary 1x1 weights (gather pre-baked in rows)
        # bp_ref:   (ctot, 1)      BN bias for primary output channels
        # wd_ref:   (new_c, 9)     BN-folded depthwise taps, tap t = (dh+1)*3 + (dw+1)
        # bd_ref:   (new_c, 1)     BN bias for depthwise output channels
        # mask_ref: (9, hw)        1.0 where the shifted source pixel is in-bounds
        # o_ref:    (1, oup, hw)
        x = x_ref[0]                                         # (cin, hw)
        wp = wp_ref[...]                                     # (ctot, cin)

        # ---- primary 1x1 conv (+ folded BN) + ReLU ------------------------
        if use_mxu:
            y = jnp.dot(wp, x, preferred_element_type=jnp.float32)
        else:
            # Tiny channel count: a 4x4-ish matmul wastes an MXU pass; do a
            # VPU broadcast multiply-accumulate over input channels instead.
            y = jnp.zeros((wp.shape[0], hw), jnp.float32)
            for c in range(cin):
                y = y + wp[:, c:c + 1] * x[c:c + 1, :]
        y = jnp.maximum(y + bp_ref[...], 0.0)                # (ctot, hw)

        if share_x1:                 # ratio == 2: channel-repeat gather is identity
            x1 = y
            x1g = y
        else:                        # generic gather: extra rows were baked into wp
            x1 = y[:init_c, :]
            x1g = y[init_c:, :]

        # ---- cheap op: depthwise 3x3 (+ folded BN) + ReLU -----------------
        # Shifts along the flattened H*W axis run on the XLU (pltpu.roll);
        # pixels whose source lies outside the image are zeroed by the mask.
        acc = jnp.zeros((new_c, hw), jnp.float32)
        for t, off in enumerate(offsets):
            src = x1g if off == 0 else pltpu.roll(x1g, shift=(-off) % hw, axis=1)
            acc = acc + (src * mask_ref[t:t + 1, :]) * wd_ref[:, t:t + 1]
        x2 = jnp.maximum(acc + bd_ref[...], 0.0)             # (new_c, hw)

        # ---- out = concat([x1, x2], channel)[:oup] ------------------------
        c1 = min(init_c, oup)
        o_ref[0, :c1, :] = x1[:c1, :].astype(o_ref.dtype)
        if oup > init_c:
            o_ref[0, init_c:oup, :] = x2[:oup - init_c, :].astype(o_ref.dtype)

    return kernel


def _make_tap_masks(h, w):
    """(9, H*W) float32: 1.0 where the 3x3 tap's source pixel is in-bounds."""
    hh = np.arange(h)
    ww = np.arange(w)
    rows = []
    for dh in (-1, 0, 1):
        mh = (hh + dh >= 0) & (hh + dh < h)
        for dw in (-1, 0, 1):
            mw = (ww + dw >= 0) & (ww + dw < w)
            rows.append((mh[:, None] & mw[None, :]).reshape(h * w))
    return jnp.asarray(np.stack(rows).astype(np.float32))


# ---------------------------------------------------------------------------
# Parameter construction (deterministic; mirrors GhostModule.__init__ shapes)
# ---------------------------------------------------------------------------
def make_ghost_params(key, inp, oup, kernel_size=1, ratio=2, dw_size=3):
    assert kernel_size == 1, "only kernel_size=1 (module default) implemented"
    assert dw_size == 3, "only dw_size=3 (module default) implemented"
    # TODO(synk): kernel_size>1 / stride>1 primary conv not implemented (module defaults).
    init_c = math.ceil(oup / ratio)
    new_c = init_c * (ratio - 1)
    eps = 1e-5

    k1, k2 = jax.random.split(key, 2)
    primary_w = jax.random.normal(k1, (init_c, inp), jnp.float32) * 0.1      # Conv2d(inp, init_c, 1), k squeezed
    dw_w = jax.random.normal(k2, (new_c, dw_size, dw_size), jnp.float32) * 0.1

    # BatchNorm (inference) affine + running stats -> folded scale / bias.
    g1 = 1.0 + 0.01 * jnp.arange(init_c, dtype=jnp.float32)
    b1 = 0.01 * jnp.arange(init_c, dtype=jnp.float32)
    m1 = jnp.zeros((init_c,), jnp.float32)
    v1 = jnp.ones((init_c,), jnp.float32)
    scale1 = g1 / jnp.sqrt(v1 + eps)
    bias1 = b1 - m1 * scale1

    g2 = 1.0 + 0.01 * jnp.arange(new_c, dtype=jnp.float32)
    b2 = 0.01 * jnp.arange(new_c, dtype=jnp.float32)
    m2 = jnp.zeros((new_c,), jnp.float32)
    v2 = jnp.ones((new_c,), jnp.float32)
    scale2 = g2 / jnp.sqrt(v2 + eps)
    bias2 = b2 - m2 * scale2

    # ---- kernel-ready params: BN scale folded into weights (one-time) -----
    w1f = primary_w * scale1[:, None]                        # (init_c, inp)
    share_x1 = (ratio == 2)                                  # gather is identity
    if share_x1:
        rows = np.arange(init_c)
    else:
        src_idx = np.arange(new_c) // (ratio - 1)            # channel-repeat gather
        rows = np.concatenate([np.arange(init_c), src_idx])
    wp = w1f[rows]                                           # (ctot, inp)
    bp = bias1[rows][:, None]                                # (ctot, 1)
    wd = dw_w.reshape(new_c, 9) * scale2[:, None]            # (new_c, 9)
    bd = bias2[:, None]                                      # (new_c, 1)

    return {
        # raw params (used by the pure-JAX reference)
        "primary_w": primary_w, "primary_scale": scale1, "primary_bias": bias1,
        "dw_w": dw_w, "dw_scale": scale2, "dw_bias": bias2,
        # kernel-ready (BN folded, gather baked into rows)
        "k_wp": wp, "k_bp": bp, "k_wd": wd, "k_bd": bd, "share_x1": share_x1,
        "oup": oup, "ratio": ratio, "dw_size": dw_size,
        "init_channels": init_c, "new_channels": new_c,
    }


# ---------------------------------------------------------------------------
# Forward: one fused pallas_call, grid over batch
# ---------------------------------------------------------------------------
def ghost_module_forward(x_nchw, params):
    oup = params["oup"]
    init_c = params["init_channels"]
    new_c = params["new_channels"]
    share_x1 = params["share_x1"]

    n, cin, h, w = x_nchw.shape
    hw = h * w
    x = x_nchw.reshape(n, cin, hw).astype(jnp.float32)       # contiguous, no transpose

    wp, bp = params["k_wp"], params["k_bp"]
    wd, bd = params["k_wd"], params["k_bd"]
    ctot = wp.shape[0]
    masks = _make_tap_masks(h, w)                            # (9, hw) trace-time constant

    use_mxu = cin >= 64                                      # tiny Cin -> VPU MAC path

    kernel = _make_ghost_kernel(cin, init_c, new_c, oup, w, hw, share_x1, use_mxu)

    # Grid over the batch: Pallas double-buffers the per-image HBM<->VMEM DMAs
    # and the "parallel" axis lets v7x split images across its 2 TensorCores.
    # Per-image VMEM footprint is (cin + oup) * hw * 4B + tiny weights, well
    # under the 32 MiB scoped default on all generations for GhostNet-sized maps.
    # TODO(synk): for very large H*W, additionally tile the spatial axis with a
    # +/-1-row halo instead of taking the full image per grid step.
    out = pl.pallas_call(
        kernel,
        out_shape=jax.ShapeDtypeStruct((n, oup, hw), jnp.float32),
        grid=(n,),
        in_specs=[
            pl.BlockSpec((1, cin, hw), lambda i: (i, 0, 0)),   # x (per image)
            pl.BlockSpec((ctot, cin), lambda i: (0, 0)),       # folded primary weight
            pl.BlockSpec((ctot, 1), lambda i: (0, 0)),         # primary bias
            pl.BlockSpec((new_c, 9), lambda i: (0, 0)),        # folded depthwise taps
            pl.BlockSpec((new_c, 1), lambda i: (0, 0)),        # depthwise bias
            pl.BlockSpec((9, hw), lambda i: (0, 0)),           # boundary masks
        ],
        out_specs=pl.BlockSpec((1, oup, hw), lambda i: (i, 0, 0)),
        compiler_params=pltpu.CompilerParams(dimension_semantics=("parallel",)),
    )(x, wp, bp, wd, bd, masks)

    return out.reshape(n, oup, h, w)                         # NCHW, contiguous reshape


# ---------------------------------------------------------------------------
# Pure-JAX reference (uses the raw, un-folded parameters)
# ---------------------------------------------------------------------------
def _reference(x_nchw, params):
    oup = params["oup"]
    ratio = params["ratio"]
    new_c = params["new_channels"]
    x = jnp.transpose(x_nchw, (0, 2, 3, 1)).astype(jnp.float32)
    x1 = jnp.einsum("nhwc,oc->nhwo", x, params["primary_w"])
    x1 = jnp.maximum(x1 * params["primary_scale"] + params["primary_bias"], 0.0)
    src_idx = jnp.arange(new_c) // (ratio - 1)
    xg = jnp.pad(x1[..., src_idx], ((0, 0), (1, 1), (1, 1), (0, 0)))
    n, h, w, _ = x1.shape
    acc = jnp.zeros((n, h, w, new_c), jnp.float32)
    for dh in range(3):
        for dw in range(3):
            acc = acc + xg[:, dh:dh + h, dw:dw + w, :] * params["dw_w"][:, dh, dw]
    x2 = jnp.maximum(acc * params["dw_scale"] + params["dw_bias"], 0.0)
    out = jnp.concatenate([x1, x2], axis=-1)[..., :oup]
    return jnp.transpose(out, (0, 3, 1, 2))


if __name__ == "__main__":
    key = jax.random.PRNGKey(0)
    kx, kp = jax.random.split(key)

    # GhostModule(inp=4, oup=8) on input (N=2, C=4, H=16, W=16), NCHW.
    N, inp, H, W = 2, 4, 16, 16
    oup = 8
    x = jax.random.normal(kx, (N, inp, H, W), jnp.float32)
    params = make_ghost_params(kp, inp, oup)

    fwd = jax.jit(lambda xx: ghost_module_forward(xx, params))
    out = jax.block_until_ready(fwd(x))

    ref = _reference(x, params)
    assert out.shape == (N, oup, H, W), out.shape
    assert jnp.allclose(out, ref, atol=1e-4, rtol=1e-4), "mismatch vs reference"
    print("KERNEL_OK")
</pallas_src>

<mosaic_0001>
module attributes {stable_mosaic.version = 11 : i64} {
  func.func @kernel(%arg0: i32, %arg1: memref<1x4x256xf32, #tpu.memory_space<vmem>>, %arg2: memref<4x4xf32, #tpu.memory_space<vmem>>, %arg3: memref<4x1xf32, #tpu.memory_space<vmem>>, %arg4: memref<4x9xf32, #tpu.memory_space<vmem>>, %arg5: memref<4x1xf32, #tpu.memory_space<vmem>>, %arg6: memref<9x256xf32, #tpu.memory_space<vmem>>, %arg7: memref<1x8x256xf32, #tpu.memory_space<vmem>>) attributes {dimension_semantics = [#tpu.dimension_semantics<parallel>], iteration_bounds = array<i64: 2>, scalar_prefetch = 0 : i64, scratch_operands = 0 : i64, tpu.core_type = #tpu.core_type<tc>, window_params = [{transform_indices = @transform_0, window_bounds = array<i64: 1, 4, 256>}, {pipeline_mode = #tpu.pipeline_mode<synchronous>, transform_indices = @transform_1, window_bounds = array<i64: 4, 4>}, {pipeline_mode = #tpu.pipeline_mode<synchronous>, transform_indices = @transform_2, window_bounds = array<i64: 4, 1>}, {pipeline_mode = #tpu.pipeline_mode<synchronous>, transform_indices = @transform_3, window_bounds = array<i64: 4, 9>}, {pipeline_mode = #tpu.pipeline_mode<synchronous>, transform_indices = @transform_4, window_bounds = array<i64: 4, 1>}, {pipeline_mode = #tpu.pipeline_mode<synchronous>, transform_indices = @transform_5, window_bounds = array<i64: 9, 256>}, {transform_indices = @transform_6, window_bounds = array<i64: 1, 8, 256>}]} {
    %c0 = arith.constant 0 : index
    %c0_0 = arith.constant 0 : index
    %c0_1 = arith.constant 0 : index
    %0 = vector.load %arg1[%c0, %c0_0, %c0_1] : memref<1x4x256xf32, #tpu.memory_space<vmem>>, vector<1x4x256xf32>
    %1 = vector.shape_cast %0 : vector<1x4x256xf32> to vector<4x256xf32>
    %c0_2 = arith.constant 0 : index
    %c0_3 = arith.constant 0 : index
    %2 = vector.load %arg2[%c0_2, %c0_3] : memref<4x4xf32, #tpu.memory_space<vmem>>, vector<4x4xf32>
    %cst = arith.constant 0.000000e+00 : f32
    %3 = vector.broadcast %cst : f32 to vector<4x256xf32>
    %4 = vector.extract_strided_slice %2 {offsets = [0, 0], sizes = [4, 1], strides = [1, 1]} : vector<4x4xf32> to vector<4x1xf32>
    %5 = vector.extract_strided_slice %1 {offsets = [0, 0], sizes = [1, 256], strides = [1, 1]} : vector<4x256xf32> to vector<1x256xf32>
    %6 = vector.broadcast %4 : vector<4x1xf32> to vector<4x256xf32>
    %7 = vector.broadcast %5 : vector<1x256xf32> to vector<4x256xf32>
    %8 = arith.mulf %6, %7 : vector<4x256xf32>
    %9 = arith.addf %3, %8 : vector<4x256xf32>
    %10 = vector.extract_strided_slice %2 {offsets = [0, 1], sizes = [4, 1], strides = [1, 1]} : vector<4x4xf32> to vector<4x1xf32>
    %11 = vector.extract_strided_slice %1 {offsets = [1, 0], sizes = [1, 256], strides = [1, 1]} : vector<4x256xf32> to vector<1x256xf32>
    %12 = vector.broadcast %10 : vector<4x1xf32> to vector<4x256xf32>
    %13 = vector.broadcast %11 : vector<1x256xf32> to vector<4x256xf32>
    %14 = arith.mulf %12, %13 : vector<4x256xf32>
    %15 = arith.addf %9, %14 : vector<4x256xf32>
    %16 = vector.extract_strided_slice %2 {offsets = [0, 2], sizes = [4, 1], strides = [1, 1]} : vector<4x4xf32> to vector<4x1xf32>
    %17 = vector.extract_strided_slice %1 {offsets = [2, 0], sizes = [1, 256], strides = [1, 1]} : vector<4x256xf32> to vector<1x256xf32>
    %18 = vector.broadcast %16 : vector<4x1xf32> to vector<4x256xf32>
    %19 = vector.broadcast %17 : vector<1x256xf32> to vector<4x256xf32>
    %20 = arith.mulf %18, %19 : vector<4x256xf32>
    %21 = arith.addf %15, %20 : vector<4x256xf32>
    %22 = vector.extract_strided_slice %2 {offsets = [0, 3], sizes = [4, 1], strides = [1, 1]} : vector<4x4xf32> to vector<4x1xf32>
    %23 = vector.extract_strided_slice %1 {offsets = [3, 0], sizes = [1, 256], strides = [1, 1]} : vector<4x256xf32> to vector<1x256xf32>
    %24 = vector.broadcast %22 : vector<4x1xf32> to vector<4x256xf32>
    %25 = vector.broadcast %23 : vector<1x256xf32> to vector<4x256xf32>
    %26 = arith.mulf %24, %25 : vector<4x256xf32>
    %27 = arith.addf %21, %26 : vector<4x256xf32>
    %c0_4 = arith.constant 0 : index
    %c0_5 = arith.constant 0 : index
    %28 = vector.load %arg3[%c0_4, %c0_5] : memref<4x1xf32, #tpu.memory_space<vmem>>, vector<4x1xf32>
    %29 = vector.broadcast %28 : vector<4x1xf32> to vector<4x256xf32>
    %30 = arith.addf %27, %29 : vector<4x256xf32>
    %cst_6 = arith.constant 0.000000e+00 : f32
    %31 = vector.broadcast %cst_6 : f32 to vector<4x256xf32>
    %32 = arith.maximumf %30, %31 : vector<4x256xf32>
    %cst_7 = arith.constant 0.000000e+00 : f32
    %33 = vector.broadcast %cst_7 : f32 to vector<4x256xf32>
    %c17_i32 = arith.constant 17 : i32
    %34 = tpu.dynamic_rotate %32 by %c17_i32 dim 1 : vector<4x256xf32>, i32 -> vector<4x256xf32>
    %c0_8 = arith.constant 0 : index
    %c0_9 = arith.constant 0 : index
    %35 = vector.load %arg6[%c0_8, %c0_9] : memref<9x256xf32, #tpu.memory_space<vmem>>, vector<1x256xf32>
    %36 = vector.broadcast %35 : vector<1x256xf32> to vector<4x256xf32>
    %37 = arith.mulf %34, %36 : vector<4x256xf32>
    %c0_10 = arith.constant 0 : index
    %c0_11 = arith.constant 0 : index
    %38 = vector.load %arg4[%c0_10, %c0_11] : memref<4x9xf32, #tpu.memory_space<vmem>>, vector<4x1xf32>
    %39 = vector.broadcast %38 : vector<4x1xf32> to vector<4x256xf32>
    %40 = arith.mulf %37, %39 : vector<4x256xf32>
    %41 = arith.addf %33, %40 : vector<4x256xf32>
    %c16_i32 = arith.constant 16 : i32
    %42 = tpu.dynamic_rotate %32 by %c16_i32 dim 1 : vector<4x256xf32>, i32 -> vector<4x256xf32>
    %c1 = arith.constant 1 : index
    %c0_12 = arith.constant 0 : index
    %43 = vector.load %arg6[%c1, %c0_12] : memref<9x256xf32, #tpu.memory_space<vmem>>, vector<1x256xf32>
    %44 = vector.broadcast %43 : vector<1x256xf32> to vector<4x256xf32>
    %45 = arith.mulf %42, %44 : vector<4x256xf32>
    %c0_13 = arith.constant 0 : index
    %c1_14 = arith.constant 1 : index
    %46 = vector.load %arg4[%c0_13, %c1_14] : memref<4x9xf32, #tpu.memory_space<vmem>>, vector<4x1xf32>
    %47 = vector.broadcast %46 : vector<4x1xf32> to vector<4x256xf32>
    %48 = arith.mulf %45, %47 : vector<4x256xf32>
    %49 = arith.addf %41, %48 : vector<4x256xf32>
    %c15_i32 = arith.constant 15 : i32
    %50 = tpu.dynamic_rotate %32 by %c15_i32 dim 1 : vector<4x256xf32>, i32 -> vector<4x256xf32>
    %c2 = arith.constant 2 : index
    %c0_15 = arith.constant 0 : index
    %51 = vector.load %arg6[%c2, %c0_15] : memref<9x256xf32, #tpu.memory_space<vmem>>, vector<1x256xf32>
    %52 = vector.broadcast %51 : vector<1x256xf32> to vector<4x256xf32>
    %53 = arith.mulf %50, %52 : vector<4x256xf32>
    %c0_16 = arith.constant 0 : index
    %c2_17 = arith.constant 2 : index
    %54 = vector.load %arg4[%c0_16, %c2_17] : memref<4x9xf32, #tpu.memory_space<vmem>>, vector<4x1xf32>
    %55 = vector.broadcast %54 : vector<4x1xf32> to vector<4x256xf32>
    %56 = arith.mulf %53, %55 : vector<4x256xf32>
    %57 = arith.addf %49, %56 : vector<4x256xf32>
    %c1_i32 = arith.constant 1 : i32
    %58 = tpu.dynamic_rotate %32 by %c1_i32 dim 1 : vector<4x256xf32>, i32 -> vector<4x256xf32>
    %c3 = arith.constant 3 : index
    %c0_18 = arith.constant 0 : index
    %59 = vector.load %arg6[%c3, %c0_18] : memref<9x256xf32, #tpu.memory_space<vmem>>, vector<1x256xf32>
    %60 = vector.broadcast %59 : vector<1x256xf32> to vector<4x256xf32>
    %61 = arith.mulf %58, %60 : vector<4x256xf32>
    %c0_19 = arith.constant 0 : index
    %c3_20 = arith.constant 3 : index
    %62 = vector.load %arg4[%c0_19, %c3_20] : memref<4x9xf32, #tpu.memory_space<vmem>>, vector<4x1xf32>
    %63 = vector.broadcast %62 : vector<4x1xf32> to vector<4x256xf32>
    %64 = arith.mulf %61, %63 : vector<4x256xf32>
    %65 = arith.addf %57, %64 : vector<4x256xf32>
    %c4 = arith.constant 4 : index
    %c0_21 = arith.constant 0 : index
    %66 = vector.load %arg6[%c4, %c0_21] : memref<9x256xf32, #tpu.memory_space<vmem>>, vector<1x256xf32>
    %67 = vector.broadcast %66 : vector<1x256xf32> to vector<4x256xf32>
    %68 = arith.mulf %32, %67 : vector<4x256xf32>
    %c0_22 = arith.constant 0 : index
    %c4_23 = arith.constant 4 : index
    %69 = vector.load %arg4[%c0_22, %c4_23] : memref<4x9xf32, #tpu.memory_space<vmem>>, vector<4x1xf32>
    %70 = vector.broadcast %69 : vector<4x1xf32> to vector<4x256xf32>
    %71 = arith.mulf %68, %70 : vector<4x256xf32>
    %72 = arith.addf %65, %71 : vector<4x256xf32>
    %c255_i32 = arith.constant 255 : i32
    %73 = tpu.dynamic_rotate %32 by %c255_i32 dim 1 : vector<4x256xf32>, i32 -> vector<4x256xf32>
    %c5 = arith.constant 5 : index
    %c0_24 = arith.constant 0 : index
    %74 = vector.load %arg6[%c5, %c0_24] : memref<9x256xf32, #tpu.memory_space<vmem>>, vector<1x256xf32>
    %75 = vector.broadcast %74 : vector<1x256xf32> to vector<4x256xf32>
    %76 = arith.mulf %73, %75 : vector<4x256xf32>
    %c0_25 = arith.constant 0 : index
    %c5_26 = arith.constant 5 : index
    %77 = vector.load %arg4[%c0_25, %c5_26] : memref<4x9xf32, #tpu.memory_space<vmem>>, vector<4x1xf32>
    %78 = vector.broadcast %77 : vector<4x1xf32> to vector<4x256xf32>
    %79 = arith.mulf %76, %78 : vector<4x256xf32>
    %80 = arith.addf %72, %79 : vector<4x256xf32>
    %c241_i32 = arith.constant 241 : i32
    %81 = tpu.dynamic_rotate %32 by %c241_i32 dim 1 : vector<4x256xf32>, i32 -> vector<4x256xf32>
    %c6 = arith.constant 6 : index
    %c0_27 = arith.constant 0 : index
    %82 = vector.load %arg6[%c6, %c0_27] : memref<9x256xf32, #tpu.memory_space<vmem>>, vector<1x256xf32>
    %83 = vector.broadcast %82 : vector<1x256xf32> to vector<4x256xf32>
    %84 = arith.mulf %81, %83 : vector<4x256xf32>
    %c0_28 = arith.constant 0 : index
    %c6_29 = arith.constant 6 : index
    %85 = vector.load %arg4[%c0_28, %c6_29] : memref<4x9xf32, #tpu.memory_space<vmem>>, vector<4x1xf32>
    %86 = vector.broadcast %85 : vector<4x1xf32> to vector<4x256xf32>
    %87 = arith.mulf %84, %86 : vector<4x256xf32>
    %88 = arith.addf %80, %87 : vector<4x256xf32>
    %c240_i32 = arith.constant 240 : i32
    %89 = tpu.dynamic_rotate %32 by %c240_i32 dim 1 : vector<4x256xf32>, i32 -> vector<4x256xf32>
    %c7 = arith.constant 7 : index
    %c0_30 = arith.constant 0 : index
    %90 = vector.load %arg6[%c7, %c0_30] : memref<9x256xf32, #tpu.memory_space<vmem>>, vector<1x256xf32>
    %91 = vector.broadcast %90 : vector<1x256xf32> to vector<4x256xf32>
    %92 = arith.mulf %89, %91 : vector<4x256xf32>
    %c0_31 = arith.constant 0 : index
    %c7_32 = arith.constant 7 : index
    %93 = vector.load %arg4[%c0_31, %c7_32] : memref<4x9xf32, #tpu.memory_space<vmem>>, vector<4x1xf32>
    %94 = vector.broadcast %93 : vector<4x1xf32> to vector<4x256xf32>
    %95 = arith.mulf %92, %94 : vector<4x256xf32>
    %96 = arith.addf %88, %95 : vector<4x256xf32>
    %c239_i32 = arith.constant 239 : i32
    %97 = tpu.dynamic_rotate %32 by %c239_i32 dim 1 : vector<4x256xf32>, i32 -> vector<4x256xf32>
    %c8 = arith.constant 8 : index
    %c0_33 = arith.constant 0 : index
    %98 = vector.load %arg6[%c8, %c0_33] : memref<9x256xf32, #tpu.memory_space<vmem>>, vector<1x256xf32>
    %99 = vector.broadcast %98 : vector<1x256xf32> to vector<4x256xf32>
    %100 = arith.mulf %97, %99 : vector<4x256xf32>
    %c0_34 = arith.constant 0 : index
    %c8_35 = arith.constant 8 : index
    %101 = vector.load %arg4[%c0_34, %c8_35] : memref<4x9xf32, #tpu.memory_space<vmem>>, vector<4x1xf32>
    %102 = vector.broadcast %101 : vector<4x1xf32> to vector<4x256xf32>
    %103 = arith.mulf %100, %102 : vector<4x256xf32>
    %104 = arith.addf %96, %103 : vector<4x256xf32>
    %c0_36 = arith.constant 0 : index
    %c0_37 = arith.constant 0 : index
    %105 = vector.load %arg5[%c0_36, %c0_37] : memref<4x1xf32, #tpu.memory_space<vmem>>, vector<4x1xf32>
    %106 = vector.broadcast %105 : vector<4x1xf32> to vector<4x256xf32>
    %107 = arith.addf %104, %106 : vector<4x256xf32>
    %cst_38 = arith.constant 0.000000e+00 : f32
    %108 = vector.broadcast %cst_38 : f32 to vector<4x256xf32>
    %109 = arith.maximumf %107, %108 : vector<4x256xf32>
    %c0_39 = arith.constant 0 : index
    %c0_40 = arith.constant 0 : index
    %c0_41 = arith.constant 0 : index
    %110 = vector.load %arg7[%c0_39, %c0_40, %c0_41] : memref<1x8x256xf32, #tpu.memory_space<vmem>>, vector<1x4x256xf32>
    %111 = vector.shape_cast %110 : vector<1x4x256xf32> to vector<4x256xf32>
    %112 = vector.shape_cast %32 : vector<4x256xf32> to vector<1x4x256xf32>
    tpu.vector_store %arg7[%c0_39, %c0_40, %c0_41], %112 {strides = array<i32>} : memref<1x8x256xf32, #tpu.memory_space<vmem>>, vector<1x4x256xf32>,
    %c0_42 = arith.constant 0 : index
    %c4_43 = arith.constant 4 : index
    %c0_44 = arith.constant 0 : index
    %113 = vector.load %arg7[%c0_42, %c4_43, %c0_44] : memref<1x8x256xf32, #tpu.memory_space<vmem>>, vector<1x4x256xf32>
    %114 = vector.shape_cast %113 : vector<1x4x256xf32> to vector<4x256xf32>
    %115 = vector.shape_cast %109 : vector<4x256xf32> to vector<1x4x256xf32>
    tpu.vector_store %arg7[%c0_42, %c4_43, %c0_44], %115 {strides = array<i32>} : memref<1x8x256xf32, #tpu.memory_space<vmem>>, vector<1x4x256xf32>,
    return
  }
  func.func @transform_0(%arg0: i32) -> (i32, i32, i32) {
    %c0_i32 = arith.constant 0 : i32
    %c0_i32_0 = arith.constant 0 : i32
    %c0_i32_1 = arith.constant 0 : i32
    return %arg0, %c0_i32, %c0_i32_0 : i32, i32, i32
  }
  func.func @transform_1(%arg0: i32) -> (i32, i32) {
    %c0_i32 = arith.constant 0 : i32
    %c0_i32_0 = arith.constant 0 : i32
    %c0_i32_1 = arith.constant 0 : i32
    return %c0_i32, %c0_i32_0 : i32, i32
  }
  func.func @transform_2(%arg0: i32) -> (i32, i32) {
    %c0_i32 = arith.constant 0 : i32
    %c0_i32_0 = arith.constant 0 : i32
    %c0_i32_1 = arith.constant 0 : i32
    return %c0_i32, %c0_i32_0 : i32, i32
  }
  func.func @transform_3(%arg0: i32) -> (i32, i32) {
    %c0_i32 = arith.constant 0 : i32
    %c0_i32_0 = arith.constant 0 : i32
    %c0_i32_1 = arith.constant 0 : i32
    return %c0_i32, %c0_i32_0 : i32, i32
  }
  func.func @transform_4(%arg0: i32) -> (i32, i32) {
    %c0_i32 = arith.constant 0 : i32
    %c0_i32_0 = arith.constant 0 : i32
    %c0_i32_1 = arith.constant 0 : i32
    return %c0_i32, %c0_i32_0 : i32, i32
  }
  func.func @transform_5(%arg0: i32) -> (i32, i32) {
    %c0_i32 = arith.constant 0 : i32
    %c0_i32_0 = arith.constant 0 : i32
    %c0_i32_1 = arith.constant 0 : i32
    return %c0_i32, %c0_i32_0 : i32, i32
  }
  func.func @transform_6(%arg0: i32) -> (i32, i32, i32) {
    %c0_i32 = arith.constant 0 : i32
    %c0_i32_0 = arith.constant 0 : i32
    %c0_i32_1 = arith.constant 0 : i32
    return %arg0, %c0_i32, %c0_i32_0 : i32, i32, i32
  }
}

</mosaic_0001>

<bundles_post_ra>
// kernel: _lambda_.1
= control target key start
LH: loop header
LB: loop body
LE: loop exit
PB: predicated region body
PF: predicated region fallthrough
CT: control target
= control target key end

     0   :  { %s831_s21 = smov 0   ;;  %s1001_s0 = inlined_call_operand.vmem [shape: f32[2,4,256], index: 0, kind: input, shape index: {}]   ;;  %s1002_s1 = inlined_call_operand.vmem [shape: f32[4,4], index: 1, kind: input, shape index: {}]   ;;  %s1003_s2 = inlined_call_operand.vmem [shape: f32[4,1], index: 2, kind: input, shape index: {}, may-alias: {2,4}]   ;;  %s1004_s3 = inlined_call_operand.vmem [shape: f32[4,9], index: 3, kind: input, shape index: {}]   ;;  %s1005_s4 = inlined_call_operand.vmem [shape: f32[4,1], index: 4, kind: input, shape index: {}, may-alias: {2,4}]   ;;  %s1006_s5 = inlined_call_operand.vmem [shape: f32[9,256], index: 5, kind: input, shape index: {}]   ;;  %s1007_s6 = inlined_call_operand.vmem [shape: f32[2,8,256], index: 6, kind: output, shape index: {}]  }
   0x1 LB: > { %s711_s22 = sadd.s32 4294967295, %s777_s21   ;;  %p715_p0 = scmp.ge.s32.totalorder %s777_s21, 1  ;;  %s777_s21 = sphi %s831_s21, %s16_s21  }
   0x2   : > { %p212_p1 = scmp.lt.s32.totalorder %s777_s21, 3 }
   0x4   : > { %p213_p2 = pnand %p715_p0, %p212_p1 }
   0x5   : > { %v253_v0 = vld [vmem:[%s1002_s1] sm:$0xf] (!%p213_p2)  ;;  %v779_v1 = vmov (!%p213_p2), 0   ;;  %v780_v2 = vmov (!%p213_p2), 2   ;;  %v781_v3 = vmov (!%p213_p2), 1   ;;  %v782_v4 = vmov (!%p213_p2), 3  }
   0x6   : > { %216 = sbr.rel (%p213_p2) target bundleno = 321 (0x141), region = 44  ;;  %757 = vset.pattern.permute.xlu0 (!%p213_p2), %v779_v1  ;;  %759 = vset.pattern.permute.xlu1 (!%p213_p2), %v780_v2  ;;  %v360_v5 = vld [vmem:[%s1003_s2] sm:$0xf] (!%p213_p2)  ;;  %v783_v7 = vmov (!%p213_p2), 4   ;;  %v784_v8 = vmov (!%p213_p2), 5   ;;  %v785_v9 = vmov (!%p213_p2), 6   ;;  %v260_v12 = vlaneseq (!%p213_p2) }
   0x7   : > { %256 = vperm.xlu0 (!%p213_p2), %757, %v253_v0   ;;  %309 = vperm.xlu1 (!%p213_p2), %759, %v253_v0   ;;  %v393_v6 = vld [vmem:[%s1004_s3] sm:$0xf] (!%p213_p2)  ;;  %v786_v10 = vmov (!%p213_p2), 8   ;;  %v787_v11 = vmov (!%p213_p2), 7   ;;  %p242_p3 = scmp.lt.s32.totalorder (!%p213_p2), %s711_s22, 1  ;;  %s788_s13 = smov (!%p213_p2), 17  }
   0x8   : > { %v261_v13 = vshrl.u32 (!%p213_p2), %v260_v12, 7  ;;  %s789_s14 = smov (!%p213_p2), 16   ;;  %s790_s15 = smov (!%p213_p2), 15   ;;  %v636_v62 = vld [vmem:[%s1005_s4] sm:$0xf] (!%p213_p2) }
   0x9   : > { %s791_s16 = smov (!%p213_p2), 127   ;;  %s792_s17 = smov (!%p213_p2), 113  }
   0xa   : > { %v859_v14 = vsub.s32 (!%p213_p2), 0, %v261_v13  ;;  %v266_v15 = vsub.s32 (!%p213_p2), 4, %v261_v13  ;;  %v861_v16 = vsub.s32 (!%p213_p2), 1, %v261_v13  ;;  %v292_v17 = vsub.s32 (!%p213_p2), 5, %v261_v13  ;;  %s793_s18 = smov (!%p213_p2), 1   ;;  %s794_s19 = smov (!%p213_p2), 111  }
   0xb   : > { %758 = vset.pattern.permute.xlu0 (!%p213_p2), %v781_v3  ;;  %760 = vset.pattern.permute.xlu1 (!%p213_p2), %v782_v4  ;;  %v314_v19 = vsub.s32 (!%p213_p2), 2, %v261_v13  ;;  %v318_v20 = vsub.s32 (!%p213_p2), 6, %v261_v13  ;;  %v340_v21 = vsub.s32 (!%p213_p2), 3, %v261_v13  ;;  %v344_v22 = vsub.s32 (!%p213_p2), 7, %v261_v13  ;;  %s795_s23 = smov (!%p213_p2), 112  }
   0xc   : > { %283 = vperm.xlu0 (!%p213_p2), %758, %v253_v0   ;;  %335 = vperm.xlu1 (!%p213_p2), %760, %v253_v0   ;;  %v915_v13 = vand.u32 (!%p213_p2), 127, %v260_v12 }
   0xd   : > { %s1009_s22 = smov (!%p242_p3, %s711_s22), 1 }
   0xe   : > { %s730_s29 = sshll.u32 %s1009_s22, 3  ;;  %s731_s9 = sshll.u32 %s1009_s22, 4  ;;  %vm407_vm0 = vcmp.lt.s32.totalorder %v915_v13, 16  ;;  %vm376_vm1 = vcmp.lt.s32.totalorder %v915_v13, 17  ;;  %vm437_vm2 = vcmp.lt.s32.totalorder %v915_v13, 15  ;;  %vm467_vm3 = vcmp.lt.s32.totalorder %v915_v13, 1 }
   0xf   : > { %s246_s8 = scalar_lea.vmem %s1001_s0, %s730_s29  ;;  %s873_s12 = scalar_lea.vmem %s1007_s6, %s731_s9  ;;  %vm520_vm4 = vcmp.lt.s32.totalorder %v915_v13, 127  ;;  %vm550_vm5 = vcmp.lt.s32.totalorder %v915_v13, 113  ;;  %vm580_vm6 = vcmp.lt.s32.totalorder %v915_v13, 112  ;;  %vm610_vm7 = vcmp.lt.s32.totalorder %v915_v13, 111 }
  0x10   : > { %761 = vset.pattern.permute.xlu1 %v779_v1  ;;  %764 = vset.pattern.permute.xlu0 %v782_v4  ;;  %v252_v18 = vld [vmem:[%s246_s8] sm:$0xff] }
  0x11   : > { %363 = vperm.xlu1 %761, %v360_v5   ;;  %486 = vperm.xlu0 %764, %v393_v6   ;;  %v263_v23 = vrot.slane %v252_v18, %v859_v14  ;;  %v267_v24 = vrot.slane %v252_v18, %v266_v15  ;;  %v289_v25 = vrot.slane %v252_v18, %v861_v16 }
  0x12   : > { %v293_v26 = vrot.slane %v252_v18, %v292_v17  ;;  %v315_v27 = vrot.slane %v252_v18, %v314_v19  ;;  %v319_v28 = vrot.slane %v252_v18, %v318_v20  ;;  %v341_v31 = vrot.slane %v252_v18, %v340_v21  ;;  %v720_v17 = vld [vmem:[%s1006_s5 + $0x1] ss:$8 sm:$0x3]  ;;  %v721_v20 = vld [vmem:[%s1006_s5 + $0x2] ss:$8 sm:$0x3] }
  0x13   : > { %v345_v32 = vrot.slane %v252_v18, %v344_v22  ;;  %v273_v33 = vrot.slane %v263_v23, %v859_v14  ;;  %v277_v34 = vrot.slane %v267_v24, %v859_v14  ;;  %v299_v35 = vrot.slane %v289_v25, %v861_v16  ;;  %v379_v18 = vld [vmem:[%s1006_s5] ss:$8 sm:$0x3] }
  0x14   : > { %v303_v36 = vrot.slane %v293_v26, %v861_v16  ;;  %v325_v37 = vrot.slane %v315_v27, %v314_v19  ;;  %v329_v38 = vrot.slane %v319_v28, %v314_v19  ;;  %v351_v39 = vrot.slane %v341_v31, %v340_v21  ;;  %v722_v26 = vld [vmem:[%s1006_s5 + $0x3] ss:$8 sm:$0x3] }
  0x15   : > { %765 = vset.pattern.permute.xlu0 %v783_v7  ;;  %762 = vset.pattern.permute.xlu1 %v781_v3  ;;  %v355_v40 = vrot.slane %v345_v32, %v340_v21  ;;  %v416_v12 = vrot.slane %v720_v17, %v859_v14  ;;  %v420_v21 = vrot.slane %v720_v17, %v861_v16 }
  0x16   : > { %509 = vperm.xlu0 %765, %v393_v6   ;;  %426 = vperm.xlu1 %762, %v393_v6   ;;  %v384_v23 = vrot.slane %v379_v18, %v859_v14  ;;  %v388_v27 = vrot.slane %v379_v18, %v861_v16  ;;  %v446_v28 = vrot.slane %v721_v20, %v859_v14 }
  0x1a   : > { %763 = vset.pattern.permute.xlu1 %v780_v2  ;;  %766 = vset.pattern.permute.xlu0 %v784_v8 }
  0x1b   : > { %456 = vperm.xlu1 %763, %v393_v6   ;;  %539 = vperm.xlu0 %766, %v393_v6  }
  0x1f   : > { %767 = vset.pattern.permute.xlu1 %v785_v9  ;;  %769 = vset.pattern.permute.xlu0 %v786_v10 }
  0x20   : > { %569 = vperm.xlu1 %767, %v393_v6   ;;  %629 = vperm.xlu0 %769, %v393_v6  }
  0x24   : > { %768 = vset.pattern.permute.xlu1 %v787_v11  ;;  %770 = vset.pattern.permute.xlu0 %v779_v1 }
  0x25   : > { %599 = vperm.xlu1 %768, %v393_v6   ;;  %396 = vperm.xlu0 %770, %v393_v6  }
  0x86   : > { %v257_v29 = vpop.permute.xlu0 %256  ;;  %v310_v30 = vpop.permute.xlu1 %309 }
  0x87   : > { %v278_v43 = vmul.f32 %v273_v33, %v257_v29  ;;  %v279_v44 = vmul.f32 %v277_v34, %v257_v29  ;;  %v330_v47 = vmul.f32 %v325_v37, %v310_v30  ;;  %v331_v48 = vmul.f32 %v329_v38, %v310_v30 }
  0x88   : > { %v450_v29 = vrot.slane %v721_v20, %v861_v16  ;;  %v480_v37 = vrot.slane %v722_v26, %v861_v16 }
  0x8b   : > { %v284_v41 = vpop.permute.xlu0 %283  ;;  %v336_v42 = vpop.permute.xlu1 %335 }
  0x8c   : > { %v304_v45 = vmul.f32 %v299_v35, %v284_v41  ;;  %v305_v46 = vmul.f32 %v303_v36, %v284_v41  ;;  %v356_v51 = vmul.f32 %v351_v39, %v336_v42  ;;  %v357_v52 = vmul.f32 %v355_v40, %v336_v42  ;;  %v723_v41 = vld [vmem:[%s1006_s5 + $0x4] ss:$8 sm:$0x3] }
  0x8d   : > { %v476_v36 = vrot.slane %v722_v26, %v859_v14 }
  0x8e   : > { %v306_v49 = vadd.f32 %v304_v45, %v278_v43  ;;  %v307_v50 = vadd.f32 %v305_v46, %v279_v44 }
  0x90   : > { %v332_v53 = vadd.f32 %v330_v47, %v306_v49  ;;  %v333_v54 = vadd.f32 %v331_v48, %v307_v50  ;;  %v364_v55 = vpop.permute.xlu1 %363  ;;  %v902_v0 = vpop.permute.xlu0 %486 }
  0x92   : > { %v358_v56 = vadd.f32 %v356_v51, %v332_v53  ;;  %v359_v57 = vadd.f32 %v357_v52, %v333_v54  ;;  %v724_v51 = vld [vmem:[%s1006_s5 + $0x5] ss:$8 sm:$0x3]  ;;  %v499_v53 = vrot.slane %v723_v41, %v859_v14  ;;  %v503_v54 = vrot.slane %v723_v41, %v861_v16 }
  0x94   : > { %v366_v58 = vadd.f32 %v364_v55, %v358_v56  ;;  %v367_v59 = vadd.f32 %v364_v55, %v359_v57 }
  0x95   : > { %v427_v63 = vpop.permute.xlu1 %426  ;;  %v904_v2 = vpop.permute.xlu0 %509 }
  0x96   : > { %v875_v60 = vmax.f32 %v366_v58, 0.0  ;;  %v877_v61 = vmax.f32 %v367_v59, 0.0  ;;  %v529_v59 = vrot.slane %v724_v51, %v859_v14 }
  0x98   : > { %372 = vrot.lane.b32.xlu1 %v877_v61, %s788_s13  ;;  %370 = vrot.lane.b32.xlu0 %v875_v60, %s788_s13  ;;  %647 = vst [vmem:[%s873_s12 + $0x8] sm:$0xf] %v877_v61  ;;  %646 = vst [vmem:[%s873_s12] sm:$0xf] %v875_v60 }
  0x9a   : > { %v457_v1 = vpop.permute.xlu1 %456  ;;  %v908_v4 = vpop.permute.xlu0 %539 }
  0x9c   : > { %405 = vrot.lane.b32.xlu1 %v877_v61, %s789_s14  ;;  %403 = vrot.lane.b32.xlu0 %v875_v60, %s789_s14 }
  0x9f   : > { %v906_v3 = vpop.permute.xlu1 %569  ;;  %v912_v6 = vpop.permute.xlu0 %629 }
  0xa0   : > { %433 = vrot.lane.b32.xlu1 %v875_v60, %s790_s15  ;;  %518 = vrot.lane.b32.xlu0 %v877_v61, %s791_s16 }
  0xa4   : > { %435 = vrot.lane.b32.xlu1 %v877_v61, %s790_s15  ;;  %546 = vrot.lane.b32.xlu0 %v875_v60, %s792_s17  ;;  %v910_v5 = vpop.permute.xlu1 %599  ;;  %v397_v8 = vpop.permute.xlu0 %396 }
  0xa8   : > { %463 = vrot.lane.b32.xlu1 %v875_v60, %s793_s18  ;;  %606 = vrot.lane.b32.xlu0 %v875_v60, %s794_s19 }
  0xac   : > { %465 = vrot.lane.b32.xlu1 %v877_v61, %s793_s18  ;;  %639 = vperm.xlu0 %770, %v636_v62   ;;  %v533_v62 = vrot.slane %v724_v51, %v861_v16 }
  0xb0   : > { %516 = vrot.lane.b32.xlu1 %v875_v60, %s791_s16 }
  0xb4   : > { %548 = vrot.lane.b32.xlu1 %v877_v61, %s792_s17 }
  0xb8   : > { %576 = vrot.lane.b32.xlu1 %v875_v60, %s795_s23 }
  0xbc   : > { %578 = vrot.lane.b32.xlu1 %v877_v61, %s795_s23 }
  0xc0   : > { %608 = vrot.lane.b32.xlu1 %v877_v61, %s794_s19 }
 0x10a   : > { %v373_v7 = vpop.permute.xlu1 %372  ;;  %v371_v10 = vpop.permute.xlu0 %370 }
 0x10b   : > { %v377_v30 = vsel %vm376_vm1, %v371_v10, %v373_v7  ;;  %v378_v31 = vsel %vm376_vm1, %v373_v7, %v371_v10 }
 0x10c   : > { %v391_v42 = vmul.f32 %v384_v23, %v378_v31  ;;  %v392_v43 = vmul.f32 %v388_v27, %v377_v30 }
 0x10e   : > { %v406_v9 = vpop.permute.xlu1 %405  ;;  %v404_v19 = vpop.permute.xlu0 %403  ;;  %v399_v55 = vmul.f32 %v397_v8, %v391_v42  ;;  %v400_v56 = vmul.f32 %v397_v8, %v392_v43  ;;  %v506_v8 = vmul.f32 %v499_v53, %v875_v60 }
 0x10f   : > { %v408_v24 = vsel %vm407_vm0, %v404_v19, %v406_v9  ;;  %v409_v25 = vsel %vm407_vm0, %v406_v9, %v404_v19 }
 0x110   : > { %v423_v34 = vmul.f32 %v416_v12, %v409_v25  ;;  %v424_v35 = vmul.f32 %v420_v21, %v408_v24 }
 0x112   : > { %v434_v11 = vpop.permute.xlu1 %433  ;;  %v429_v46 = vmul.f32 %v427_v63, %v423_v34  ;;  %v430_v47 = vmul.f32 %v427_v63, %v424_v35  ;;  %v519_v48 = vpop.permute.xlu0 %518  ;;  %v725_v63 = vld [vmem:[%s1006_s5 + $0x6] ss:$8 sm:$0x3]  ;;  %v727_v34 = vld [vmem:[%s1006_s5 + $0x10] ss:$8 sm:$0x3] }
 0x113   : > { %v559_v21 = vrot.slane %v725_v63, %v859_v14  ;;  %v619_v41 = vrot.slane %v727_v34, %v859_v14  ;;  %v623_v42 = vrot.slane %v727_v34, %v861_v16 }
 0x114   : > { %v431_v7 = vadd.f32 %v429_v46, %v399_v55  ;;  %v432_v9 = vadd.f32 %v430_v47, %v400_v56 }
 0x116   : > { %v436_v15 = vpop.permute.xlu1 %435  ;;  %v547_v12 = vpop.permute.xlu0 %546 }
 0x117   : > { %v438_v32 = vsel %vm437_vm2, %v434_v11, %v436_v15  ;;  %v439_v33 = vsel %vm437_vm2, %v436_v15, %v434_v11 }
 0x118   : > { %v453_v44 = vmul.f32 %v446_v28, %v439_v33  ;;  %v454_v45 = vmul.f32 %v450_v29, %v438_v32  ;;  %v512_v28 = vmul.f32 %v904_v2, %v506_v8 }
 0x11a   : > { %v464_v22 = vpop.permute.xlu1 %463  ;;  %v459_v57 = vmul.f32 %v457_v1, %v453_v44  ;;  %v460_v58 = vmul.f32 %v457_v1, %v454_v45  ;;  %v507_v1 = vmul.f32 %v503_v54, %v877_v61  ;;  %v726_v61 = vld [vmem:[%s1006_s5 + $0x7] ss:$8 sm:$0x3]  ;;  %v607_v47 = vpop.permute.xlu0 %606 }
 0x11b   : > { %v589_v32 = vrot.slane %v726_v61, %v859_v14  ;;  %v593_v33 = vrot.slane %v726_v61, %v861_v16 }
 0x11c   : > { %v461_v19 = vadd.f32 %v459_v57, %v431_v7  ;;  %v462_v20 = vadd.f32 %v460_v58, %v432_v9  ;;  %v513_v29 = vmul.f32 %v904_v2, %v507_v1 }
 0x11e   : > { %v466_v38 = vpop.permute.xlu1 %465 }
 0x11f   : > { %v468_v39 = vsel %vm467_vm3, %v464_v22, %v466_v38  ;;  %v469_v40 = vsel %vm467_vm3, %v466_v38, %v464_v22  ;;  %v563_v22 = vrot.slane %v725_v63, %v861_v16 }
 0x120   : > { %v483_v49 = vmul.f32 %v476_v36, %v469_v40  ;;  %v484_v50 = vmul.f32 %v480_v37, %v468_v39 }
 0x122   : > { %v517_v52 = vpop.permute.xlu1 %516  ;;  %v489_v10 = vmul.f32 %v902_v0, %v483_v49  ;;  %v490_v11 = vmul.f32 %v902_v0, %v484_v50 }
 0x123   : > { %v521_v17 = vsel %vm520_vm4, %v517_v52, %v519_v48  ;;  %v522_v18 = vsel %vm520_vm4, %v519_v48, %v517_v52 }
 0x124   : > { %v491_v23 = vadd.f32 %v489_v10, %v461_v19  ;;  %v492_v24 = vadd.f32 %v490_v11, %v462_v20  ;;  %v536_v25 = vmul.f32 %v529_v59, %v521_v17  ;;  %v537_v26 = vmul.f32 %v533_v62, %v522_v18 }
 0x126   : > { %v549_v15 = vpop.permute.xlu1 %548  ;;  %v514_v35 = vadd.f32 %v512_v28, %v491_v23  ;;  %v515_v36 = vadd.f32 %v513_v29, %v492_v24  ;;  %v542_v37 = vmul.f32 %v908_v4, %v536_v25  ;;  %v543_v2 = vmul.f32 %v908_v4, %v537_v26 }
 0x127   : > { %v551_v0 = vsel %vm550_vm5, %v547_v12, %v549_v15  ;;  %v552_v60 = vsel %vm550_vm5, %v549_v15, %v547_v12 }
 0x128   : > { %v566_v30 = vmul.f32 %v559_v21, %v551_v0  ;;  %v567_v31 = vmul.f32 %v563_v22, %v552_v60  ;;  %v544_v48 = vadd.f32 %v542_v37, %v514_v35  ;;  %v545_v49 = vadd.f32 %v543_v2, %v515_v36 }
 0x12a   : > { %v577_v27 = vpop.permute.xlu1 %576  ;;  %v572_v43 = vmul.f32 %v906_v3, %v566_v30  ;;  %v573_v44 = vmul.f32 %v906_v3, %v567_v31 }
 0x12b   : > { %v640_v62 = vpop.permute.xlu0 %639 }
 0x12c   : > { %v574_v16 = vadd.f32 %v572_v43, %v544_v48  ;;  %v575_v53 = vadd.f32 %v573_v44, %v545_v49 }
 0x12e   : > { %v579_v38 = vpop.permute.xlu1 %578 }
 0x12f   : > { %v581_v39 = vsel %vm580_vm6, %v577_v27, %v579_v38  ;;  %v582_v40 = vsel %vm580_vm6, %v579_v38, %v577_v27 }
 0x130   : > { %v596_v45 = vmul.f32 %v589_v32, %v581_v39  ;;  %v597_v46 = vmul.f32 %v593_v33, %v582_v40 }
 0x132   : > { %v602_v50 = vmul.f32 %v910_v5, %v596_v45  ;;  %v603_v4 = vmul.f32 %v910_v5, %v597_v46  ;;  %v609_v51 = vpop.permute.xlu1 %608 }
 0x133   : > { %v611_v52 = vsel %vm610_vm7, %v607_v47, %v609_v51  ;;  %v612_v14 = vsel %vm610_vm7, %v609_v51, %v607_v47 }
 0x134   : > { %v626_v3 = vmul.f32 %v619_v41, %v611_v52  ;;  %v627_v54 = vmul.f32 %v623_v42, %v612_v14  ;;  %v604_v55 = vadd.f32 %v602_v50, %v574_v16  ;;  %v605_v56 = vadd.f32 %v603_v4, %v575_v53 }
 0x136   : > { %v632_v57 = vmul.f32 %v912_v6, %v626_v3  ;;  %v633_v58 = vmul.f32 %v912_v6, %v627_v54 }
 0x138   : > { %v634_v5 = vadd.f32 %v632_v57, %v604_v55  ;;  %v635_v59 = vadd.f32 %v633_v58, %v605_v56 }
 0x13a   : > { %v642_v63 = vadd.f32 %v640_v62, %v634_v5  ;;  %v643_v7 = vadd.f32 %v640_v62, %v635_v59 }
 0x13c   : > { %v644_v9 = vmax.f32 %v642_v63, 0.0  ;;  %v645_v13 = vmax.f32 %v643_v7, 0.0 }
 0x13e   : > { %v650_v10 = vrot.slane %v644_v9, 4  ;;  %v651_v11 = vrot.slane %v645_v13, 4 }
 0x140   : > { %654 = vst [vmem:[%s873_s12] sm:$0xf0] %v650_v10  ;;  %655 = vst [vmem:[%s873_s12 + $0x8] sm:$0xf0] %v651_v11 }
 0x141 PF: > { %s16_s21 = sadd.s32 1, %s777_s21  }
 0x142   : > { %p13_p4 = scmp.ge.s32.totalorder %s16_s21, 4  }
 0x144   :  { %15 = sbr.rel (!%p13_p4) target bundleno = 1 (0x1), region = 82 }

</bundles_post_ra>
